<compile_context>
chip_gen: v7x
topology: tpu7x:2x2x1
jax: 0.10.0
libtpu: 0.0.40
codegen_flags: <defaults>
</compile_context>

<pallas_src>
import numpy as np
import jax
import jax.numpy as jnp
from jax.experimental import pallas as pl
from jax.experimental.pallas import tpu as pltpu


# --------------------------------------------------------------------------- #
# theta packing helpers (identical split order to the PyTorch module)
# --------------------------------------------------------------------------- #
def _split_sizes(input_dim, layerwidths):
    sizes = [input_dim * layerwidths[0], layerwidths[0]]
    for i in range(1, len(layerwidths)):
        sizes += [layerwidths[i - 1] * layerwidths[i], layerwidths[i]]
    sizes += [layerwidths[-1], 1]
    return sizes


def _split_theta(theta, input_dim, layerwidths):
    """Split flat theta exactly like torch.split(split_sizes, dim=1)."""
    sizes = _split_sizes(input_dim, layerwidths)
    offsets = np.cumsum([0] + sizes)
    return [theta[:, offsets[i]:offsets[i + 1]] for i in range(len(sizes))]


def _round_up(x, m):
    return ((x + m - 1) // m) * m


# --------------------------------------------------------------------------- #
# kernel
# --------------------------------------------------------------------------- #
def _make_kernel(nblayers, e_block, activation):
    def kernel(x_ref, *rest):
        out_ref = rest[-1]
        p = rest[:-1]                      # 2*nblayers + 2 parameter refs
        xb = x_ref[...]                    # (input_dim, x_block) -- examples on lanes

        rows = []
        for e in range(e_block):           # static unroll over ensemble members
            h = xb
            for i in range(nblayers):
                w = p[2 * i][e]            # (L_out, L_in)  (native torch layout)
                b = p[2 * i + 1][e]        # (L_out, 1)     (lane-broadcast bias)
                h = activation(
                    jnp.dot(w, h, preferred_element_type=jnp.float32) + b)
            w_out = p[2 * nblayers][e]     # (1, L_last)
            b_out = p[2 * nblayers + 1][e] # (1, 1)
            y = jnp.dot(w_out, h, preferred_element_type=jnp.float32) + b_out
            rows.append(y)                 # (1, x_block) -- lane-dense

        if e_block == 1:
            out_ref[...] = rows[0]
        else:
            out_ref[...] = jnp.concatenate(rows, axis=0)   # one dense store
    return kernel


# --------------------------------------------------------------------------- #
# wrapper
# --------------------------------------------------------------------------- #
def mlp_ensemble_forward(x, theta, input_dim, layerwidths, activation=jnp.tanh):
    """Pallas equivalent of mlp(input_dim, layerwidths, activation).forward(x, theta)."""
    if isinstance(layerwidths, int):
        layerwidths = [layerwidths]
    nblayers = len(layerwidths)
    nb_theta = theta.shape[0]
    nb_x = x.shape[0]

    # ---- tiling choices (lane-dense, generation-safe sizes) ----------------
    # x tile on lanes: multiple of 128, capped at 512 (fits comfortably in the
    # default scoped VMEM on v5e/v6e and the smaller 64 MiB VMEM on v7x).
    if nb_x <= 512:
        nb_x_pad = max(_round_up(nb_x, 128), 128)
        x_block = nb_x_pad
    else:
        nb_x_pad = _round_up(nb_x, 512)
        x_block = 512

    # ensemble-member block: amortize per-step overhead; keep the sublane block
    # either the full (padded) extent or a multiple of 8.
    if nb_theta <= 8:
        e_block = nb_theta
        nb_theta_pad = nb_theta
    else:
        e_block = 8
        nb_theta_pad = _round_up(nb_theta, 8)

    # ---- glue: pad + repack parameters (plain JAX, outside the kernel) -----
    x_t = jnp.pad(x, ((0, nb_x_pad - nb_x), (0, 0))).T          # (input_dim, nb_x_pad)
    theta_p = jnp.pad(theta, ((0, nb_theta_pad - nb_theta), (0, 0)))
    pieces = _split_theta(theta_p, input_dim, layerwidths)

    params = []
    in_features = [input_dim] + list(layerwidths)
    for i in range(nblayers):
        w = pieces[2 * i].reshape(nb_theta_pad, layerwidths[i], in_features[i])
        b = pieces[2 * i + 1].reshape(nb_theta_pad, layerwidths[i], 1)
        params += [w, b]
    w_out = pieces[2 * nblayers].reshape(nb_theta_pad, 1, layerwidths[-1])
    b_out = pieces[2 * nblayers + 1].reshape(nb_theta_pad, 1, 1)
    params += [w_out, b_out]

    # ---- specs --------------------------------------------------------------
    in_specs = [pl.BlockSpec((input_dim, x_block), lambda e, xi: (0, xi))]
    for arr in params:
        a, b = arr.shape[1], arr.shape[2]
        in_specs.append(pl.BlockSpec((e_block, a, b), lambda e, xi: (e, 0, 0)))
    out_spec = pl.BlockSpec((e_block, x_block), lambda e, xi: (e, xi))

    grid = (nb_theta_pad // e_block, nb_x_pad // x_block)
    kernel = _make_kernel(nblayers, e_block, activation)

    out = pl.pallas_call(
        kernel,
        out_shape=jax.ShapeDtypeStruct((nb_theta_pad, nb_x_pad), jnp.float32),
        grid_spec=pltpu.PrefetchScalarGridSpec(
            num_scalar_prefetch=0,
            grid=grid,
            in_specs=in_specs,
            out_specs=out_spec,
        ),
        compiler_params=pltpu.CompilerParams(
            dimension_semantics=("parallel", "parallel")),
    )(x_t, *params)

    # strip padding and restore the PyTorch output shape (nb_theta, nb_x, 1)
    return out[:nb_theta, :nb_x].reshape(nb_theta, nb_x, 1)


# --------------------------------------------------------------------------- #
# pure-JAX reference (transliteration of the PyTorch forward)
# --------------------------------------------------------------------------- #
def ref_forward(x, theta, input_dim, layerwidths, activation=jnp.tanh):
    if isinstance(layerwidths, int):
        layerwidths = [layerwidths]
    nblayers = len(layerwidths)
    nb_theta = theta.shape[0]
    nb_x = x.shape[0]
    t = _split_theta(theta, input_dim, layerwidths)
    m = x.reshape(nb_x, input_dim, 1)[None]                                 # (1,N,D,1)
    m = jnp.matmul(t[0].reshape(nb_theta, 1, layerwidths[0], input_dim), m)
    m = m + t[1].reshape(nb_theta, 1, layerwidths[0], 1)
    m = activation(m)
    for i in range(nblayers - 1):
        m = jnp.matmul(t[2 * i + 2].reshape(nb_theta, 1, layerwidths[i + 1],
                                            layerwidths[i]), m)
        m = m + t[2 * i + 3].reshape(nb_theta, 1, layerwidths[i + 1], 1)
        m = activation(m)
    m = jnp.matmul(t[2 * (nblayers - 1) + 2].reshape(nb_theta, 1, 1,
                                                     layerwidths[-1]), m)
    m = m + t[2 * (nblayers - 1) + 3].reshape(nb_theta, 1, 1, 1)
    return m.squeeze(-1)                                                    # (E,N,1)


# --------------------------------------------------------------------------- #
if __name__ == "__main__":
    input_dim = 8
    layerwidths = [32, 32]
    nb_x = 64
    nb_theta = 4
    param_count = int(np.sum(_split_sizes(input_dim, layerwidths)))

    key = jax.random.PRNGKey(0)
    kx, kt = jax.random.split(key)
    x = jax.random.normal(kx, (nb_x, input_dim), dtype=jnp.float32)
    theta = 0.5 * jax.random.normal(kt, (nb_theta, param_count), dtype=jnp.float32)

    out = mlp_ensemble_forward(x, theta, input_dim, layerwidths, activation=jnp.tanh)
    out = jax.block_until_ready(out)

    ref = ref_forward(x, theta, input_dim, layerwidths, activation=jnp.tanh)
    assert out.shape == (nb_theta, nb_x, 1), out.shape
    np.testing.assert_allclose(np.asarray(out), np.asarray(ref), rtol=1e-2, atol=1e-2)

    print("KERNEL_OK")
</pallas_src>

<mosaic_0001>
module attributes {stable_mosaic.version = 11 : i64} {
  func.func @kernel(%arg0: i32, %arg1: i32, %arg2: memref<8x128xf32, #tpu.memory_space<vmem>>, %arg3: memref<4x32x8xf32, #tpu.memory_space<vmem>>, %arg4: memref<4x32x1xf32, #tpu.memory_space<vmem>>, %arg5: memref<4x32x32xf32, #tpu.memory_space<vmem>>, %arg6: memref<4x32x1xf32, #tpu.memory_space<vmem>>, %arg7: memref<4x1x32xf32, #tpu.memory_space<vmem>>, %arg8: memref<4x1x1xf32, #tpu.memory_space<vmem>>, %arg9: memref<4x128xf32, #tpu.memory_space<vmem>>) attributes {dimension_semantics = [#tpu.dimension_semantics<parallel>, #tpu.dimension_semantics<parallel>], iteration_bounds = array<i64: 1, 1>, scalar_prefetch = 0 : i64, scratch_operands = 0 : i64, tpu.core_type = #tpu.core_type<tc>, window_params = [{transform_indices = @transform_0, window_bounds = array<i64: 8, 128>}, {transform_indices = @transform_1, window_bounds = array<i64: 4, 32, 8>}, {transform_indices = @transform_2, window_bounds = array<i64: 4, 32, 1>}, {transform_indices = @transform_3, window_bounds = array<i64: 4, 32, 32>}, {transform_indices = @transform_4, window_bounds = array<i64: 4, 32, 1>}, {transform_indices = @transform_5, window_bounds = array<i64: 4, 1, 32>}, {transform_indices = @transform_6, window_bounds = array<i64: 4, 1, 1>}, {transform_indices = @transform_7, window_bounds = array<i64: 4, 128>}]} {
    %c0 = arith.constant 0 : index
    %c0_0 = arith.constant 0 : index
    %0 = vector.load %arg2[%c0, %c0_0] : memref<8x128xf32, #tpu.memory_space<vmem>>, vector<8x128xf32>
    %c0_1 = arith.constant 0 : index
    %c0_2 = arith.constant 0 : index
    %c0_3 = arith.constant 0 : index
    %1 = vector.load %arg3[%c0_1, %c0_2, %c0_3] : memref<4x32x8xf32, #tpu.memory_space<vmem>>, vector<1x32x8xf32>
    %2 = vector.shape_cast %1 : vector<1x32x8xf32> to vector<32x8xf32>
    %c0_4 = arith.constant 0 : index
    %c0_5 = arith.constant 0 : index
    %c0_6 = arith.constant 0 : index
    %3 = vector.load %arg4[%c0_4, %c0_5, %c0_6] : memref<4x32x1xf32, #tpu.memory_space<vmem>>, vector<1x32x1xf32>
    %4 = vector.shape_cast %3 : vector<1x32x1xf32> to vector<32x1xf32>
    %cst = arith.constant dense<0.000000e+00> : vector<32x128xf32>
    %5 = tpu.matmul %2, %0, %cst {dimension_numbers = #tpu.dot_dimension_numbers<[1], [0], [0], [1], [0, 0, 1, 1], [], []>} : vector<32x8xf32>, vector<8x128xf32>, vector<32x128xf32> -> vector<32x128xf32>
    %6 = vector.broadcast %4 : vector<32x1xf32> to vector<32x128xf32>
    %7 = arith.addf %5, %6 : vector<32x128xf32>
    %8 = math.tanh %7 : vector<32x128xf32>
    %c0_7 = arith.constant 0 : index
    %c0_8 = arith.constant 0 : index
    %c0_9 = arith.constant 0 : index
    %9 = vector.load %arg5[%c0_7, %c0_8, %c0_9] : memref<4x32x32xf32, #tpu.memory_space<vmem>>, vector<1x32x32xf32>
    %10 = vector.shape_cast %9 : vector<1x32x32xf32> to vector<32x32xf32>
    %c0_10 = arith.constant 0 : index
    %c0_11 = arith.constant 0 : index
    %c0_12 = arith.constant 0 : index
    %11 = vector.load %arg6[%c0_10, %c0_11, %c0_12] : memref<4x32x1xf32, #tpu.memory_space<vmem>>, vector<1x32x1xf32>
    %12 = vector.shape_cast %11 : vector<1x32x1xf32> to vector<32x1xf32>
    %cst_13 = arith.constant dense<0.000000e+00> : vector<32x128xf32>
    %13 = tpu.matmul %10, %8, %cst_13 {dimension_numbers = #tpu.dot_dimension_numbers<[1], [0], [0], [1], [0, 0, 1, 1], [], []>} : vector<32x32xf32>, vector<32x128xf32>, vector<32x128xf32> -> vector<32x128xf32>
    %14 = vector.broadcast %12 : vector<32x1xf32> to vector<32x128xf32>
    %15 = arith.addf %13, %14 : vector<32x128xf32>
    %16 = math.tanh %15 : vector<32x128xf32>
    %c0_14 = arith.constant 0 : index
    %c0_15 = arith.constant 0 : index
    %c0_16 = arith.constant 0 : index
    %17 = vector.load %arg7[%c0_14, %c0_15, %c0_16] : memref<4x1x32xf32, #tpu.memory_space<vmem>>, vector<1x1x32xf32>
    %18 = vector.shape_cast %17 : vector<1x1x32xf32> to vector<1x32xf32>
    %c0_17 = arith.constant 0 : index
    %c0_18 = arith.constant 0 : index
    %c0_19 = arith.constant 0 : index
    %19 = vector.load %arg8[%c0_17, %c0_18, %c0_19] : memref<4x1x1xf32, #tpu.memory_space<vmem>>, vector<1x1x1xf32>
    %20 = vector.shape_cast %19 : vector<1x1x1xf32> to vector<1x1xf32>
    %cst_20 = arith.constant dense<0.000000e+00> : vector<1x128xf32>
    %21 = tpu.matmul %18, %16, %cst_20 {dimension_numbers = #tpu.dot_dimension_numbers<[1], [0], [0], [1], [0, 0, 1, 1], [], []>} : vector<1x32xf32>, vector<32x128xf32>, vector<1x128xf32> -> vector<1x128xf32>
    %22 = vector.broadcast %20 : vector<1x1xf32> to vector<1x128xf32>
    %23 = arith.addf %21, %22 : vector<1x128xf32>
    %c1 = arith.constant 1 : index
    %c0_21 = arith.constant 0 : index
    %c0_22 = arith.constant 0 : index
    %24 = vector.load %arg3[%c1, %c0_21, %c0_22] : memref<4x32x8xf32, #tpu.memory_space<vmem>>, vector<1x32x8xf32>
    %25 = vector.shape_cast %24 : vector<1x32x8xf32> to vector<32x8xf32>
    %c1_23 = arith.constant 1 : index
    %c0_24 = arith.constant 0 : index
    %c0_25 = arith.constant 0 : index
    %26 = vector.load %arg4[%c1_23, %c0_24, %c0_25] : memref<4x32x1xf32, #tpu.memory_space<vmem>>, vector<1x32x1xf32>
    %27 = vector.shape_cast %26 : vector<1x32x1xf32> to vector<32x1xf32>
    %cst_26 = arith.constant dense<0.000000e+00> : vector<32x128xf32>
    %28 = tpu.matmul %25, %0, %cst_26 {dimension_numbers = #tpu.dot_dimension_numbers<[1], [0], [0], [1], [0, 0, 1, 1], [], []>} : vector<32x8xf32>, vector<8x128xf32>, vector<32x128xf32> -> vector<32x128xf32>
    %29 = vector.broadcast %27 : vector<32x1xf32> to vector<32x128xf32>
    %30 = arith.addf %28, %29 : vector<32x128xf32>
    %31 = math.tanh %30 : vector<32x128xf32>
    %c1_27 = arith.constant 1 : index
    %c0_28 = arith.constant 0 : index
    %c0_29 = arith.constant 0 : index
    %32 = vector.load %arg5[%c1_27, %c0_28, %c0_29] : memref<4x32x32xf32, #tpu.memory_space<vmem>>, vector<1x32x32xf32>
    %33 = vector.shape_cast %32 : vector<1x32x32xf32> to vector<32x32xf32>
    %c1_30 = arith.constant 1 : index
    %c0_31 = arith.constant 0 : index
    %c0_32 = arith.constant 0 : index
    %34 = vector.load %arg6[%c1_30, %c0_31, %c0_32] : memref<4x32x1xf32, #tpu.memory_space<vmem>>, vector<1x32x1xf32>
    %35 = vector.shape_cast %34 : vector<1x32x1xf32> to vector<32x1xf32>
    %cst_33 = arith.constant dense<0.000000e+00> : vector<32x128xf32>
    %36 = tpu.matmul %33, %31, %cst_33 {dimension_numbers = #tpu.dot_dimension_numbers<[1], [0], [0], [1], [0, 0, 1, 1], [], []>} : vector<32x32xf32>, vector<32x128xf32>, vector<32x128xf32> -> vector<32x128xf32>
    %37 = vector.broadcast %35 : vector<32x1xf32> to vector<32x128xf32>
    %38 = arith.addf %36, %37 : vector<32x128xf32>
    %39 = math.tanh %38 : vector<32x128xf32>
    %c1_34 = arith.constant 1 : index
    %c0_35 = arith.constant 0 : index
    %c0_36 = arith.constant 0 : index
    %40 = vector.load %arg7[%c1_34, %c0_35, %c0_36] : memref<4x1x32xf32, #tpu.memory_space<vmem>>, vector<1x1x32xf32>
    %41 = vector.shape_cast %40 : vector<1x1x32xf32> to vector<1x32xf32>
    %c1_37 = arith.constant 1 : index
    %c0_38 = arith.constant 0 : index
    %c0_39 = arith.constant 0 : index
    %42 = vector.load %arg8[%c1_37, %c0_38, %c0_39] : memref<4x1x1xf32, #tpu.memory_space<vmem>>, vector<1x1x1xf32>
    %43 = vector.shape_cast %42 : vector<1x1x1xf32> to vector<1x1xf32>
    %cst_40 = arith.constant dense<0.000000e+00> : vector<1x128xf32>
    %44 = tpu.matmul %41, %39, %cst_40 {dimension_numbers = #tpu.dot_dimension_numbers<[1], [0], [0], [1], [0, 0, 1, 1], [], []>} : vector<1x32xf32>, vector<32x128xf32>, vector<1x128xf32> -> vector<1x128xf32>
    %45 = vector.broadcast %43 : vector<1x1xf32> to vector<1x128xf32>
    %46 = arith.addf %44, %45 : vector<1x128xf32>
    %c2 = arith.constant 2 : index
    %c0_41 = arith.constant 0 : index
    %c0_42 = arith.constant 0 : index
    %47 = vector.load %arg3[%c2, %c0_41, %c0_42] : memref<4x32x8xf32, #tpu.memory_space<vmem>>, vector<1x32x8xf32>
    %48 = vector.shape_cast %47 : vector<1x32x8xf32> to vector<32x8xf32>
    %c2_43 = arith.constant 2 : index
    %c0_44 = arith.constant 0 : index
    %c0_45 = arith.constant 0 : index
    %49 = vector.load %arg4[%c2_43, %c0_44, %c0_45] : memref<4x32x1xf32, #tpu.memory_space<vmem>>, vector<1x32x1xf32>
    %50 = vector.shape_cast %49 : vector<1x32x1xf32> to vector<32x1xf32>
    %cst_46 = arith.constant dense<0.000000e+00> : vector<32x128xf32>
    %51 = tpu.matmul %48, %0, %cst_46 {dimension_numbers = #tpu.dot_dimension_numbers<[1], [0], [0], [1], [0, 0, 1, 1], [], []>} : vector<32x8xf32>, vector<8x128xf32>, vector<32x128xf32> -> vector<32x128xf32>
    %52 = vector.broadcast %50 : vector<32x1xf32> to vector<32x128xf32>
    %53 = arith.addf %51, %52 : vector<32x128xf32>
    %54 = math.tanh %53 : vector<32x128xf32>
    %c2_47 = arith.constant 2 : index
    %c0_48 = arith.constant 0 : index
    %c0_49 = arith.constant 0 : index
    %55 = vector.load %arg5[%c2_47, %c0_48, %c0_49] : memref<4x32x32xf32, #tpu.memory_space<vmem>>, vector<1x32x32xf32>
    %56 = vector.shape_cast %55 : vector<1x32x32xf32> to vector<32x32xf32>
    %c2_50 = arith.constant 2 : index
    %c0_51 = arith.constant 0 : index
    %c0_52 = arith.constant 0 : index
    %57 = vector.load %arg6[%c2_50, %c0_51, %c0_52] : memref<4x32x1xf32, #tpu.memory_space<vmem>>, vector<1x32x1xf32>
    %58 = vector.shape_cast %57 : vector<1x32x1xf32> to vector<32x1xf32>
    %cst_53 = arith.constant dense<0.000000e+00> : vector<32x128xf32>
    %59 = tpu.matmul %56, %54, %cst_53 {dimension_numbers = #tpu.dot_dimension_numbers<[1], [0], [0], [1], [0, 0, 1, 1], [], []>} : vector<32x32xf32>, vector<32x128xf32>, vector<32x128xf32> -> vector<32x128xf32>
    %60 = vector.broadcast %58 : vector<32x1xf32> to vector<32x128xf32>
    %61 = arith.addf %59, %60 : vector<32x128xf32>
    %62 = math.tanh %61 : vector<32x128xf32>
    %c2_54 = arith.constant 2 : index
    %c0_55 = arith.constant 0 : index
    %c0_56 = arith.constant 0 : index
    %63 = vector.load %arg7[%c2_54, %c0_55, %c0_56] : memref<4x1x32xf32, #tpu.memory_space<vmem>>, vector<1x1x32xf32>
    %64 = vector.shape_cast %63 : vector<1x1x32xf32> to vector<1x32xf32>
    %c2_57 = arith.constant 2 : index
    %c0_58 = arith.constant 0 : index
    %c0_59 = arith.constant 0 : index
    %65 = vector.load %arg8[%c2_57, %c0_58, %c0_59] : memref<4x1x1xf32, #tpu.memory_space<vmem>>, vector<1x1x1xf32>
    %66 = vector.shape_cast %65 : vector<1x1x1xf32> to vector<1x1xf32>
    %cst_60 = arith.constant dense<0.000000e+00> : vector<1x128xf32>
    %67 = tpu.matmul %64, %62, %cst_60 {dimension_numbers = #tpu.dot_dimension_numbers<[1], [0], [0], [1], [0, 0, 1, 1], [], []>} : vector<1x32xf32>, vector<32x128xf32>, vector<1x128xf32> -> vector<1x128xf32>
    %68 = vector.broadcast %66 : vector<1x1xf32> to vector<1x128xf32>
    %69 = arith.addf %67, %68 : vector<1x128xf32>
    %c3 = arith.constant 3 : index
    %c0_61 = arith.constant 0 : index
    %c0_62 = arith.constant 0 : index
    %70 = vector.load %arg3[%c3, %c0_61, %c0_62] : memref<4x32x8xf32, #tpu.memory_space<vmem>>, vector<1x32x8xf32>
    %71 = vector.shape_cast %70 : vector<1x32x8xf32> to vector<32x8xf32>
    %c3_63 = arith.constant 3 : index
    %c0_64 = arith.constant 0 : index
    %c0_65 = arith.constant 0 : index
    %72 = vector.load %arg4[%c3_63, %c0_64, %c0_65] : memref<4x32x1xf32, #tpu.memory_space<vmem>>, vector<1x32x1xf32>
    %73 = vector.shape_cast %72 : vector<1x32x1xf32> to vector<32x1xf32>
    %cst_66 = arith.constant dense<0.000000e+00> : vector<32x128xf32>
    %74 = tpu.matmul %71, %0, %cst_66 {dimension_numbers = #tpu.dot_dimension_numbers<[1], [0], [0], [1], [0, 0, 1, 1], [], []>} : vector<32x8xf32>, vector<8x128xf32>, vector<32x128xf32> -> vector<32x128xf32>
    %75 = vector.broadcast %73 : vector<32x1xf32> to vector<32x128xf32>
    %76 = arith.addf %74, %75 : vector<32x128xf32>
    %77 = math.tanh %76 : vector<32x128xf32>
    %c3_67 = arith.constant 3 : index
    %c0_68 = arith.constant 0 : index
    %c0_69 = arith.constant 0 : index
    %78 = vector.load %arg5[%c3_67, %c0_68, %c0_69] : memref<4x32x32xf32, #tpu.memory_space<vmem>>, vector<1x32x32xf32>
    %79 = vector.shape_cast %78 : vector<1x32x32xf32> to vector<32x32xf32>
    %c3_70 = arith.constant 3 : index
    %c0_71 = arith.constant 0 : index
    %c0_72 = arith.constant 0 : index
    %80 = vector.load %arg6[%c3_70, %c0_71, %c0_72] : memref<4x32x1xf32, #tpu.memory_space<vmem>>, vector<1x32x1xf32>
    %81 = vector.shape_cast %80 : vector<1x32x1xf32> to vector<32x1xf32>
    %cst_73 = arith.constant dense<0.000000e+00> : vector<32x128xf32>
    %82 = tpu.matmul %79, %77, %cst_73 {dimension_numbers = #tpu.dot_dimension_numbers<[1], [0], [0], [1], [0, 0, 1, 1], [], []>} : vector<32x32xf32>, vector<32x128xf32>, vector<32x128xf32> -> vector<32x128xf32>
    %83 = vector.broadcast %81 : vector<32x1xf32> to vector<32x128xf32>
    %84 = arith.addf %82, %83 : vector<32x128xf32>
    %85 = math.tanh %84 : vector<32x128xf32>
    %c3_74 = arith.constant 3 : index
    %c0_75 = arith.constant 0 : index
    %c0_76 = arith.constant 0 : index
    %86 = vector.load %arg7[%c3_74, %c0_75, %c0_76] : memref<4x1x32xf32, #tpu.memory_space<vmem>>, vector<1x1x32xf32>
    %87 = vector.shape_cast %86 : vector<1x1x32xf32> to vector<1x32xf32>
    %c3_77 = arith.constant 3 : index
    %c0_78 = arith.constant 0 : index
    %c0_79 = arith.constant 0 : index
    %88 = vector.load %arg8[%c3_77, %c0_78, %c0_79] : memref<4x1x1xf32, #tpu.memory_space<vmem>>, vector<1x1x1xf32>
    %89 = vector.shape_cast %88 : vector<1x1x1xf32> to vector<1x1xf32>
    %cst_80 = arith.constant dense<0.000000e+00> : vector<1x128xf32>
    %90 = tpu.matmul %87, %85, %cst_80 {dimension_numbers = #tpu.dot_dimension_numbers<[1], [0], [0], [1], [0, 0, 1, 1], [], []>} : vector<1x32xf32>, vector<32x128xf32>, vector<1x128xf32> -> vector<1x128xf32>
    %91 = vector.broadcast %89 : vector<1x1xf32> to vector<1x128xf32>
    %92 = arith.addf %90, %91 : vector<1x128xf32>
    %93 = tpu.concatenate %23, %46, %69, %92 in 0 : vector<1x128xf32>, vector<1x128xf32>, vector<1x128xf32>, vector<1x128xf32> -> vector<4x128xf32>
    %c0_81 = arith.constant 0 : index
    %c0_82 = arith.constant 0 : index
    %94 = vector.load %arg9[%c0_81, %c0_82] : memref<4x128xf32, #tpu.memory_space<vmem>>, vector<4x128xf32>
    tpu.vector_store %arg9[%c0_81, %c0_82], %93 {strides = array<i32>} : memref<4x128xf32, #tpu.memory_space<vmem>>, vector<4x128xf32>,
    return
  }
  func.func @transform_0(%arg0: i32, %arg1: i32) -> (i32, i32) {
    %c0_i32 = arith.constant 0 : i32
    %c0_i32_0 = arith.constant 0 : i32
    return %c0_i32, %arg1 : i32, i32
  }
  func.func @transform_1(%arg0: i32, %arg1: i32) -> (i32, i32, i32) {
    %c0_i32 = arith.constant 0 : i32
    %c0_i32_0 = arith.constant 0 : i32
    %c0_i32_1 = arith.constant 0 : i32
    return %arg0, %c0_i32, %c0_i32_0 : i32, i32, i32
  }
  func.func @transform_2(%arg0: i32, %arg1: i32) -> (i32, i32, i32) {
    %c0_i32 = arith.constant 0 : i32
    %c0_i32_0 = arith.constant 0 : i32
    %c0_i32_1 = arith.constant 0 : i32
    return %arg0, %c0_i32, %c0_i32_0 : i32, i32, i32
  }
  func.func @transform_3(%arg0: i32, %arg1: i32) -> (i32, i32, i32) {
    %c0_i32 = arith.constant 0 : i32
    %c0_i32_0 = arith.constant 0 : i32
    %c0_i32_1 = arith.constant 0 : i32
    return %arg0, %c0_i32, %c0_i32_0 : i32, i32, i32
  }
  func.func @transform_4(%arg0: i32, %arg1: i32) -> (i32, i32, i32) {
    %c0_i32 = arith.constant 0 : i32
    %c0_i32_0 = arith.constant 0 : i32
    %c0_i32_1 = arith.constant 0 : i32
    return %arg0, %c0_i32, %c0_i32_0 : i32, i32, i32
  }
  func.func @transform_5(%arg0: i32, %arg1: i32) -> (i32, i32, i32) {
    %c0_i32 = arith.constant 0 : i32
    %c0_i32_0 = arith.constant 0 : i32
    %c0_i32_1 = arith.constant 0 : i32
    return %arg0, %c0_i32, %c0_i32_0 : i32, i32, i32
  }
  func.func @transform_6(%arg0: i32, %arg1: i32) -> (i32, i32, i32) {
    %c0_i32 = arith.constant 0 : i32
    %c0_i32_0 = arith.constant 0 : i32
    %c0_i32_1 = arith.constant 0 : i32
    return %arg0, %c0_i32, %c0_i32_0 : i32, i32, i32
  }
  func.func @transform_7(%arg0: i32, %arg1: i32) -> (i32, i32) {
    %c0_i32 = arith.constant 0 : i32
    return %arg0, %arg1 : i32, i32
  }
}

</mosaic_0001>

<bundles_post_ra>
// kernel: tpu_custom_call.1
= control target key start
LH: loop header
LB: loop body
LE: loop exit
PB: predicated region body
PF: predicated region fallthrough
CT: control target
= control target key end

     0   :  { %vm56_vm0 = vcmask 64512   ;;  %v1891_v5 = vmov 0   ;;  %s2250_s0 = inlined_call_operand.vmem [shape: f32[8,128], index: 0, kind: input, shape index: {}]   ;;  %s2251_s1 = inlined_call_operand.vmem [shape: f32[4,32,8], index: 1, kind: input, shape index: {}]   ;;  %s2252_s2 = inlined_call_operand.vmem [shape: f32[4,32,1], index: 2, kind: input, shape index: {}]   ;;  %s2253_s3 = inlined_call_operand.vmem [shape: f32[4,32,32], index: 3, kind: input, shape index: {}]   ;;  %s2254_s4 = inlined_call_operand.vmem [shape: f32[4,32,1], index: 4, kind: input, shape index: {}]   ;;  %s2255_s5 = inlined_call_operand.vmem [shape: f32[4,1,32], index: 5, kind: input, shape index: {}]   ;;  %s2256_s6 = inlined_call_operand.vmem [shape: f32[4,1,1], index: 6, kind: input, shape index: {}]   ;;  %s2257_s7 = inlined_call_operand.hbm [shape: f32[4,128], index: 7, kind: output, shape index: {}]  }
   0x1   :  { %v1939_v0 = vld [vmem:[%s2250_s0] sm:$0xff]  ;;  %v29_v2 = vld [vmem:[%s2251_s1 + $0x8] sm:$0xff]  ;;  %v30_v3 = vld [vmem:[%s2251_s1 + $0x10] sm:$0xff]  ;;  %1801 = vset.pattern.permute.xlu0 %v1891_v5  ;;  %1802 = vset.pattern.permute.xlu1 %v1891_v5 }
   0x2   :  { %v28_v1 = vld [vmem:[%s2251_s1] sm:$0xff]  ;;  %1608 = vmatprep.subr.mxu0 %v1939_v0  ;;  %v34_v6 = vld [vmem:[%s2252_s2 + $0x10] sm:$0xff]  ;;  %v31_v7 = vld [vmem:[%s2251_s1 + $0x18] sm:$0xff] }
   0x3   :  { %1610 = vmatprep.mubr.msk.f32.mxu0 %vm56_vm0, %v28_v1  ;;  %v32_v4 = vld [vmem:[%s2252_s2] sm:$0xff]  ;;  %1609 = vmatpush3.msra.mxu0 %v1939_v0  ;;  %v33_v8 = vld [vmem:[%s2252_s2 + $0x8] sm:$0xff]  ;;  %v35_v9 = vld [vmem:[%s2252_s2 + $0x18] sm:$0xff] }
   0x4   :  { %1611 = vmatmul.mubr.msk.f32.vlgmr.msra.gmra.mrb[0].mxu0 %vm56_vm0, %v29_v2  ;;  %38 = vperm.xlu0 %1801, %v32_v4   ;;  %v162_v10 = vld [vmem:[%s2254_s4] sm:$0xff]  ;;  %v163_v11 = vld [vmem:[%s2254_s4 + $0x8] sm:$0xff]  ;;  %v164_v12 = vld [vmem:[%s2254_s4 + $0x10] sm:$0xff] }
   0x5   :  { %1613 = vmatprep.mubr.msk.f32.mxu0 %vm56_vm0, %v30_v3  ;;  %48 = vperm.xlu1 %1802, %v34_v6  }
   0x8   :  { %1614 = vmatmul.mubr.msk.f32.gmra.mrb[2].mxu0 %vm56_vm0, %v31_v7  ;;  %43 = vperm.xlu0 %1801, %v33_v8  }
   0x9   :  { %53 = vperm.xlu1 %1802, %v35_v9  }
   0xc   :  { %168 = vperm.xlu0 %1801, %v162_v10  }
   0xd   :  { %173 = vperm.xlu1 %1802, %v163_v11  }
   0xe   :  { %12 = vsyncpa [#allocation3], 0  ;;  %v165_v13 = vld [vmem:[%s2254_s4 + $0x18] sm:$0xff]  ;;  %v1459_v14 = vld [vmem:[%s2252_s2 + $0x20] sm:$0xff]  ;;  %vm186_vm1 = vcmask 261120   ;;  %v1892_v1 = vmov 0.0|0.0  }
   0xf   :  { %v1460_v15 = vld [vmem:[%s2252_s2 + $0x28] sm:$0xff]  ;;  %v1461_v16 = vld [vmem:[%s2252_s2 + $0x30] sm:$0xff]  ;;  %v1462_v17 = vld [vmem:[%s2252_s2 + $0x38] sm:$0xff]  ;;  %1748 = vmatprep.subr.bf16.mxu0 %v1892_v1  ;;  %vm1893_vm2 = vmmov 0   ;;  %v1894_v2 = vmov 0.0   ;;  %vm1425_vm3 = vcmask 1040384  }
  0x10   :  { %178 = vperm.xlu0 %1801, %v164_v12   ;;  %v1471_v18 = vld [vmem:[%s2254_s4 + $0x20] sm:$0xff]  ;;  %v1472_v19 = vld [vmem:[%s2254_s4 + $0x28] sm:$0xff]  ;;  %v1473_v20 = vld [vmem:[%s2254_s4 + $0x30] sm:$0xff]  ;;  %1638 = vmatprep.mubr.msk.f32.mxu0 %vm1893_vm2, %v1894_v2  ;;  %vm1427_vm4 = vcmask 1041408   ;;  %s1895_s15 = smov [#allocation2]   ;;  %vm1429_vm5 = vcmask 1042432  }
  0x11   :  { %183 = vperm.xlu1 %1802, %v165_v13   ;;  %v1474_v21 = vld [vmem:[%s2254_s4 + $0x38] sm:$0xff]  ;;  %v1486_v22 = vld [vmem:[%s2252_s2 + $0x40] sm:$0xff]  ;;  %v1487_v23 = vld [vmem:[%s2252_s2 + $0x48] sm:$0xff]  ;;  %s1438_s16 = sshll.u32 %s1895_s15, 4  ;;  %s1439_s16 = int_to_ptr.vmem [resolvable:$true] %s1438_s16 }
  0x12   :  { %v1488_v24 = vld [vmem:[%s2252_s2 + $0x50] sm:$0xff]  ;;  %v1489_v25 = vld [vmem:[%s2252_s2 + $0x58] sm:$0xff]  ;;  %v1498_v26 = vld [vmem:[%s2254_s4 + $0x40] sm:$0xff]  ;;  %s1867_s17 = scalar_lea.vmem %s1439_s16, 64  ;;  %p1872_p1 = scmp.lt.s32.totalorder %s1439_s16, %s1439_s16 }
  0x13   :  { %v1499_v27 = vld [vmem:[%s2254_s4 + $0x48] sm:$0xff]  ;;  %v1500_v28 = vld [vmem:[%s2254_s4 + $0x50] sm:$0xff]  ;;  %v1501_v29 = vld [vmem:[%s2254_s4 + $0x58] sm:$0xff]  ;;  %p1868_p0 = scmp.ne.s32.totalorder %s1439_s16, %s1867_s17  ;;  %p1873_p2 = scmp.lt.s32.totalorder %s1867_s17, %s1867_s17 }
  0x14   :  { %384 = vperm.xlu0 %1801, %v1459_v14   ;;  %v1513_v30 = vld [vmem:[%s2252_s2 + $0x60] sm:$0xff]  ;;  %v1514_v31 = vld [vmem:[%s2252_s2 + $0x68] sm:$0xff]  ;;  %v1515_v32 = vld [vmem:[%s2252_s2 + $0x70] sm:$0xff] }
  0x15   :  { %389 = vperm.xlu1 %1802, %v1460_v15   ;;  %v1516_v33 = vld [vmem:[%s2252_s2 + $0x78] sm:$0xff]  ;;  %v1525_v34 = vld [vmem:[%s2254_s4 + $0x60] sm:$0xff]  ;;  %v1526_v35 = vld [vmem:[%s2254_s4 + $0x68] sm:$0xff]  ;;  %p1874_p3 = por %p1873_p2, %p1872_p1 }
  0x16   :  { %v1527_v36 = vld [vmem:[%s2254_s4 + $0x70] sm:$0xff]  ;;  %v1528_v37 = vld [vmem:[%s2254_s4 + $0x78] sm:$0xff]  ;;  %v1480_v38 = vld [vmem:[%s2256_s6 + $0x1] sm:$0x1] }
  0x17   :  { %v1507_v39 = vld [vmem:[%s2256_s6 + $0x2] sm:$0x1]  ;;  %v289_v40 = vld [vmem:[%s2256_s6] sm:$0x1]  ;;  %v1534_v41 = vld [vmem:[%s2256_s6 + $0x3] sm:$0x1]  ;;  %p1875_p4 = pnand %p1874_p3, %p1868_p0 }
  0x18   :  { %394 = vperm.xlu0 %1801, %v1461_v16   ;;  %v158_v42 = vld [vmem:[%s2253_s3] sm:$0xff]  ;;  %v159_v61 = vld [vmem:[%s2253_s3 + $0x8] sm:$0xff]  ;;  %v160_v62 = vld [vmem:[%s2253_s3 + $0x10] sm:$0xff] }
  0x19   :  { %399 = vperm.xlu1 %1802, %v1462_v17   ;;  %1624 = vmatprep.mubr.msk.f32.mxu1 %vm186_vm1, %v158_v42  ;;  %v161_v63 = vld [vmem:[%s2253_s3 + $0x18] sm:$0xff] }
  0x1c   :  { %515 = vperm.xlu0 %1801, %v1471_v18  }
  0x1d   :  { %520 = vperm.xlu1 %1802, %v1472_v19  }
  0x20   :  { %525 = vperm.xlu0 %1801, %v1473_v20  }
  0x21   :  { %530 = vperm.xlu1 %1802, %v1474_v21   ;;  %v288_v21 = vld [vmem:[%s2255_s5] sm:$0x1] }
  0x24   :  { %732 = vperm.xlu0 %1801, %v1486_v22   ;;  %v1455_v22 = vld [vmem:[%s2251_s1 + $0x20] sm:$0xff] }
  0x25   :  { %737 = vperm.xlu1 %1802, %v1487_v23   ;;  %v1456_v23 = vld [vmem:[%s2251_s1 + $0x28] sm:$0xff] }
  0x28   :  { %742 = vperm.xlu0 %1801, %v1488_v24   ;;  %v1457_v24 = vld [vmem:[%s2251_s1 + $0x30] sm:$0xff] }
  0x29   :  { %747 = vperm.xlu1 %1802, %v1489_v25   ;;  %v1458_v25 = vld [vmem:[%s2251_s1 + $0x38] sm:$0xff] }
  0x2c   :  { %863 = vperm.xlu0 %1801, %v1498_v26   ;;  %v1467_v26 = vld [vmem:[%s2253_s3 + $0x20] sm:$0xff] }
  0x2d   :  { %868 = vperm.xlu1 %1802, %v1499_v27  }
  0x30   :  { %873 = vperm.xlu0 %1801, %v1500_v28  }
  0x31   :  { %878 = vperm.xlu1 %1802, %v1501_v29  }
  0x34   :  { %1080 = vperm.xlu0 %1801, %v1513_v30  }
  0x35   :  { %1085 = vperm.xlu1 %1802, %v1514_v31  }
  0x38   :  { %1090 = vperm.xlu0 %1801, %v1515_v32  }
  0x39   :  { %1095 = vperm.xlu1 %1802, %v1516_v33  }
  0x3c   :  { %1211 = vperm.xlu0 %1801, %v1525_v34  }
  0x3d   :  { %1216 = vperm.xlu1 %1802, %v1526_v35  }
  0x40   :  { %1221 = vperm.xlu0 %1801, %v1527_v36  }
  0x41   :  { %1226 = vperm.xlu1 %1802, %v1528_v37  }
  0x44   :  { %640 = vperm.xlu0 %1801, %v1480_v38  }
  0x45   :  { %988 = vperm.xlu1 %1802, %v1507_v39  }
  0x48   :  { %292 = vperm.xlu0 %1801, %v289_v40  }
  0x49   :  { %1336 = vperm.xlu1 %1802, %v1534_v41  }
  0x83   :  { %v39_v43 = vpop.permute.xlu0 %38 }
  0x84   :  { %v49_v44 = vpop.permute.xlu1 %48 }
  0x87   :  { %v44_v45 = vpop.permute.xlu0 %43 }
  0x88   :  { %v54_v50 = vpop.permute.xlu1 %53 }
  0x8b   :  { %v169_v4 = vpop.permute.xlu0 %168 }
  0x8c   :  { %v174_v3 = vpop.permute.xlu1 %173 }
  0x8f   :  { %v179_v11 = vpop.permute.xlu0 %178 }
  0x90   :  { %v184_v9 = vpop.permute.xlu1 %183 }
  0x93   :  { %v385_v30 = vpop.permute.xlu0 %384 }
  0x94   :  { %v390_v29 = vpop.permute.xlu1 %389 }
  0x97   :  { %v395_v37 = vpop.permute.xlu0 %394 }
  0x98   :  { %v400_v35 = vpop.permute.xlu1 %399 }
  0xd7   :  { %v1612_v46 = vpop.f32.mrb[0].mxu0 }
  0xd8   :  { %v141_v47 = vadd.f32 %v1612_v46, %v44_v45  ;;  %v135_v48 = vpop.f32.mrb[1].mxu0 }
  0xd9   :  { %v136_v49 = vadd.f32 %v135_v48, %v39_v43  ;;  %v1469_v48 = vld [vmem:[%s2253_s3 + $0x30] sm:$0xff] }
  0xda   :  { %1803 = vtanh.f32 %v141_v47  ;;  %v1468_v47 = vld [vmem:[%s2253_s3 + $0x28] sm:$0xff] }
  0xdb   :  { %1805 = vtanh.f32 %v136_v49  ;;  %v1615_v51 = vpop.f32.mrb[2].mxu0  ;;  %v1470_v49 = vld [vmem:[%s2253_s3 + $0x38] sm:$0xff] }
  0xdc   :  { %v151_v52 = vadd.f32 %v1615_v51, %v54_v50  ;;  %v145_v53 = vpop.f32.mrb[3].mxu0  ;;  %v1482_v50 = vld [vmem:[%s2251_s1 + $0x40] sm:$0xff]  ;;  %v1483_v51 = vld [vmem:[%s2251_s1 + $0x48] sm:$0xff] }
  0xdd   :  { %v146_v54 = vadd.f32 %v145_v53, %v49_v44  ;;  %v1485_v53 = vld [vmem:[%s2251_s1 + $0x58] sm:$0xff] }
  0xde   :  { %1807 = vtanh.f32 %v151_v52  ;;  %v1484_v52 = vld [vmem:[%s2251_s1 + $0x50] sm:$0xff] }
  0xdf   :  { %1809 = vtanh.f32 %v146_v54  ;;  %v521_v54 = vpop.permute.xlu1 %520 }
  0xe4   :  { %v1804_v55 = vpop.eup %1803 }
  0xe5   :  { %v1806_v56 = vpop.eup %1805 }
  0xe6   :  { %v1740_v57 = vpack.c.bf16 %v1804_v55, %v1806_v56  ;;  %v516_v55 = vpop.permute.xlu0 %515  ;;  %v531_v56 = vpop.permute.xlu1 %530 }
  0xe8   :  { %v1808_v58 = vpop.eup %1807  ;;  %1741 = vmatprep.subr.bf16.mxu1 %v1740_v57 }
  0xe9   :  { %v1810_v59 = vpop.eup %1809  ;;  %1743 = vmatpush3.bf16.msra.mxu1 %v1740_v57 }
  0xea   :  { %v1744_v60 = vpack.c.bf16 %v1808_v58, %v1810_v59  ;;  %v526_v58 = vpop.permute.xlu0 %525 }
  0xec   :  { %1745 = vmatprep.subr.bf16.mxu1 %v1744_v60 }
  0xed   :  { %1747 = vmatpush3.bf16.msra.mxu1 %v1744_v60 }
  0xf0   :  { %1625 = vmatmul.mubr.msk.f32.vlgmr.msra.gmra.mrb[0].mxu1 %vm186_vm1, %v159_v61 }
  0xf1   :  { %1627 = vmatprep.mubr.msk.f32.mxu1 %vm186_vm1, %v160_v62 }
  0xf4   :  { %1628 = vmatmul.mubr.msk.f32.gmra.mrb[2].mxu1 %vm186_vm1, %v161_v63 }
  0xf5   :  { %1657 = vmatprep.mubr.msk.f32.mxu1 %vm186_vm1, %v1467_v26  ;;  %v1494_v26 = vld [vmem:[%s2253_s3 + $0x40] sm:$0xff] }
 0x1c3   :  { %v1626_v5 = vpop.f32.mrb[0].mxu1 }
 0x1c4   :  { %v271_v6 = vadd.f32 %v1626_v5, %v174_v3  ;;  %v265_v7 = vpop.f32.mrb[1].mxu1 }
 0x1c5   :  { %v266_v8 = vadd.f32 %v265_v7, %v169_v4  ;;  %v738_v4 = vpop.permute.xlu1 %737 }
 0x1c6   :  { %1811 = vtanh.f32 %v271_v6  ;;  %v733_v6 = vpop.permute.xlu0 %732 }
 0x1c7   :  { %1813 = vtanh.f32 %v266_v8  ;;  %v1629_v10 = vpop.f32.mrb[2].mxu1 }
 0x1c8   :  { %v281_v12 = vadd.f32 %v1629_v10, %v184_v9  ;;  %v275_v13 = vpop.f32.mrb[3].mxu1 }
 0x1c9   :  { %v276_v14 = vadd.f32 %v275_v13, %v179_v11  ;;  %v748_v11 = vpop.permute.xlu1 %747 }
 0x1ca   :  { %1815 = vtanh.f32 %v281_v12 }
 0x1cb   :  { %1817 = vtanh.f32 %v276_v14  ;;  %v743_v14 = vpop.permute.xlu0 %742 }
 0x1d0   :  { %v1812_v15 = vpop.eup %1811 }
 0x1d1   :  { %v1814_v16 = vpop.eup %1813 }
 0x1d2   :  { %v1749_v17 = vpack.c.bf16 %v1812_v15, %v1814_v16 }
 0x1d4   :  { %v1816_v18 = vpop.eup %1815  ;;  %1750 = vmatpush3.bf16.msra.mxu0 %v1749_v17 }
 0x1d5   :  { %v1818_v19 = vpop.eup %1817  ;;  %1751 = vmatprep.subr.bf16.mxu0 %v1892_v1 }
 0x1d6   :  { %v1752_v20 = vpack.c.bf16 %v1816_v18, %v1818_v19 }
 0x1d8   :  { %1753 = vmatpush3.bf16.msra.mxu0 %v1752_v20 }
 0x1d9   :  { %1641 = vmatprep.subr.mxu0 %v1939_v0 }
 0x1db   :  { %1639 = vmatmul.mubr.msk.f32.vlgmr.msra.gmra.mrb[4].mxu0 %vm186_vm1, %v288_v21 }
 0x1dc   :  { %1642 = vmatpush3.msra.mxu0 %v1939_v0  ;;  %1643 = vmatprep.mubr.msk.f32.mxu0 %vm56_vm0, %v1455_v22 }
 0x1dd   :  { %1762 = vmatprep.subr.bf16.mxu0 %v1892_v1 }
 0x1df   :  { %1644 = vmatmul.mubr.msk.f32.vlgmr.msra.gmra.mrb[6].mxu0 %vm56_vm0, %v1456_v23 }
 0x1e0   :  { %1646 = vmatprep.mubr.msk.f32.mxu0 %vm56_vm0, %v1457_v24  ;;  %v1479_v24 = vld [vmem:[%s2255_s5 + $0x1] sm:$0x1] }
 0x1e3   :  { %1647 = vmatmul.mubr.msk.f32.gmra.mrb[8].mxu0 %vm56_vm0, %v1458_v25 }
 0x1e4   :  { %1671 = vmatprep.mubr.msk.f32.mxu0 %vm1893_vm2, %v1894_v2 }
 0x2ae   :  { %v2116_v27 = vpop.f32.mrb[4].mxu0 }
 0x2af   :  { %v1640_v28 = vpop.f32.mrb[5].mxu0 }
 0x2b2   :  { %v1645_v31 = vpop.f32.mrb[6].mxu0 }
 0x2b3   :  { %v486_v32 = vadd.f32 %v1645_v31, %v390_v29  ;;  %v480_v33 = vpop.f32.mrb[7].mxu0 }
 0x2b4   :  { %v481_v34 = vadd.f32 %v480_v33, %v385_v30  ;;  %v1496_v33 = vld [vmem:[%s2253_s3 + $0x50] sm:$0xff] }
 0x2b5   :  { %1819 = vtanh.f32 %v486_v32  ;;  %v1495_v32 = vld [vmem:[%s2253_s3 + $0x48] sm:$0xff] }
 0x2b6   :  { %1821 = vtanh.f32 %v481_v34  ;;  %v1648_v36 = vpop.f32.mrb[8].mxu0  ;;  %v1497_v34 = vld [vmem:[%s2253_s3 + $0x58] sm:$0xff] }
 0x2b7   :  { %v496_v38 = vadd.f32 %v1648_v36, %v400_v35  ;;  %v490_v39 = vpop.f32.mrb[9].mxu0  ;;  %v864_v35 = vpop.permute.xlu0 %863 }
 0x2b8   :  { %v491_v40 = vadd.f32 %v490_v39, %v395_v37 }
 0x2b9   :  { %1823 = vtanh.f32 %v496_v38 }
 0x2ba   :  { %1825 = vtanh.f32 %v491_v40 }
 0x2bb   :  { %v874_v36 = vpop.permute.xlu0 %873 }
 0x2bf   :  { %v1820_v41 = vpop.eup %1819  ;;  %v2172_v37 = vpop.permute.xlu0 %1080 }
 0x2c0   :  { %v1822_v42 = vpop.eup %1821 }
 0x2c1   :  { %v1754_v43 = vpack.c.bf16 %v1820_v41, %v1822_v42  ;;  %v295_v41 = vlaneseq }
 0x2c3   :  { %v1824_v44 = vpop.eup %1823  ;;  %1755 = vmatprep.subr.bf16.mxu1 %v1754_v43  ;;  %v2174_v38 = vpop.permute.xlu0 %1090  ;;  %v296_v42 = vshrl.u32 %v295_v41, 7 }
 0x2c4   :  { %v1826_v45 = vpop.eup %1825  ;;  %1757 = vmatpush3.bf16.msra.mxu1 %v1754_v43 }
 0x2c5   :  { %v1758_v46 = vpack.c.bf16 %v1824_v44, %v1826_v45  ;;  %v2180_v44 = vsub.s32 0, %v296_v42  ;;  %v1524_v42 = vld [vmem:[%s2253_s3 + $0x78] sm:$0xff] }
 0x2c7   :  { %1759 = vmatprep.subr.bf16.mxu1 %v1758_v46  ;;  %v2176_v39 = vpop.permute.xlu0 %1211 }
 0x2c8   :  { %1761 = vmatpush3.bf16.msra.mxu1 %v1758_v46 }
 0x2c9   :  { %1674 = vmatprep.subr.mxu1 %v1939_v0 }
 0x2cb   :  { %1658 = vmatmul.mubr.msk.f32.vlgmr.msra.gmra.mrb[4].mxu1 %vm186_vm1, %v1468_v47  ;;  %v2178_v40 = vpop.permute.xlu0 %1221 }
 0x2cc   :  { %1675 = vmatpush3.msra.mxu1 %v1939_v0  ;;  %1660 = vmatprep.mubr.msk.f32.mxu1 %vm186_vm1, %v1469_v48 }
 0x2cd   :  { %1776 = vmatprep.subr.bf16.mxu1 %v1892_v1 }
 0x2cf   :  { %1661 = vmatmul.mubr.msk.f32.gmra.mrb[6].mxu1 %vm186_vm1, %v1470_v49  ;;  %v641_v43 = vpop.permute.xlu0 %640 }
 0x2d0   :  { %1676 = vmatprep.mubr.msk.f32.mxu1 %vm56_vm0, %v1482_v50  ;;  %v646_v46 = vrot.slane %v641_v43, %v2180_v44 }
 0x2d3   :  { %1677 = vmatmul.mubr.msk.f32.vlgmr.msra.gmra.mrb[8].mxu1 %vm56_vm0, %v1483_v51  ;;  %v293_v45 = vpop.permute.xlu0 %292 }
 0x2d4   :  { %1679 = vmatprep.mubr.msk.f32.mxu1 %vm56_vm0, %v1484_v52  ;;  %v298_v48 = vrot.slane %v293_v45, %v2180_v44 }
 0x2d6   :  { %v369_v51 = vadd.f32 %v2116_v27, %v298_v48 }
 0x2d7   :  { %1680 = vmatmul.mubr.msk.f32.gmra.mrb[10].mxu1 %vm56_vm0, %v1485_v53 }
 0x2d8   :  { %1704 = vmatprep.mubr.msk.f32.mxu1 %vm1893_vm2, %v1894_v2 }
 0x39e   :  { %v1659_v57 = vpop.f32.mrb[4].mxu1 }
 0x39f   :  { %v617_v59 = vadd.f32 %v1659_v57, %v521_v54  ;;  %v611_v60 = vpop.f32.mrb[5].mxu1  ;;  %v869_v54 = vpop.permute.xlu1 %868 }
 0x3a0   :  { %v612_v61 = vadd.f32 %v611_v60, %v516_v55 }
 0x3a1   :  { %1827 = vtanh.f32 %v617_v59 }
 0x3a2   :  { %1829 = vtanh.f32 %v612_v61  ;;  %v1662_v62 = vpop.f32.mrb[6].mxu1 }
 0x3a3   :  { %v627_v63 = vadd.f32 %v1662_v62, %v531_v56  ;;  %v621_v3 = vpop.f32.mrb[7].mxu1  ;;  %v879_v59 = vpop.permute.xlu1 %878 }
 0x3a4   :  { %v622_v5 = vadd.f32 %v621_v3, %v526_v58 }
 0x3a5   :  { %1831 = vtanh.f32 %v627_v63 }
 0x3a6   :  { %1833 = vtanh.f32 %v622_v5  ;;  %v1678_v7 = vpop.f32.mrb[8].mxu1 }
 0x3a7   :  { %v834_v8 = vadd.f32 %v1678_v7, %v738_v4  ;;  %v828_v9 = vpop.f32.mrb[9].mxu1 }
 0x3a8   :  { %v829_v10 = vadd.f32 %v828_v9, %v733_v6  ;;  %v1509_v9 = vld [vmem:[%s2251_s1 + $0x60] sm:$0xff] }
 0x3a9   :  { %1835 = vtanh.f32 %v834_v8  ;;  %v1506_v8 = vld [vmem:[%s2255_s5 + $0x2] sm:$0x1] }
 0x3aa   :  { %1837 = vtanh.f32 %v829_v10  ;;  %v1681_v12 = vpop.f32.mrb[10].mxu1  ;;  %v1510_v10 = vld [vmem:[%s2251_s1 + $0x68] sm:$0xff] }
 0x3ab   :  { %v1828_v13 = vpop.eup %1827  ;;  %v844_v15 = vadd.f32 %v1681_v12, %v748_v11  ;;  %v838_v16 = vpop.f32.mrb[11].mxu1  ;;  %v1511_v11 = vld [vmem:[%s2251_s1 + $0x70] sm:$0xff]  ;;  %v1521_v12 = vld [vmem:[%s2253_s3 + $0x60] sm:$0xff] }
 0x3ac   :  { %v1830_v17 = vpop.eup %1829  ;;  %v839_v18 = vadd.f32 %v838_v16, %v743_v14 }
 0x3ad   :  { %1839 = vtanh.f32 %v844_v15  ;;  %v1763_v19 = vpack.c.bf16 %v1828_v13, %v1830_v17  ;;  %v1086_v13 = vpop.permute.xlu1 %1085 }
 0x3ae   :  { %1841 = vtanh.f32 %v839_v18 }
 0x3af   :  { %v1832_v20 = vpop.eup %1831  ;;  %1764 = vmatpush3.bf16.msra.mxu0 %v1763_v19 }
 0x3b0   :  { %v1834_v21 = vpop.eup %1833  ;;  %1765 = vmatprep.subr.bf16.mxu0 %v1892_v1 }
 0x3b1   :  { %v1766_v22 = vpack.c.bf16 %v1832_v20, %v1834_v21  ;;  %v1096_v14 = vpop.permute.xlu1 %1095 }
 0x3b3   :  { %v1836_v23 = vpop.eup %1835  ;;  %1767 = vmatpush3.bf16.msra.mxu0 %v1766_v22 }
 0x3b4   :  { %v1838_v25 = vpop.eup %1837 }
 0x3b5   :  { %v1768_v28 = vpack.c.bf16 %v1836_v23, %v1838_v25  ;;  %v1217_v15 = vpop.permute.xlu1 %1216 }
 0x3b6   :  { %1672 = vmatmul.mubr.msk.f32.vlgmr.msra.gmra.mrb[10].mxu0 %vm186_vm1, %v1479_v24 }
 0x3b7   :  { %v1840_v29 = vpop.eup %1839  ;;  %1769 = vmatprep.subr.bf16.mxu0 %v1768_v28  ;;  %1690 = vmatprep.mubr.msk.f32.mxu0 %vm186_vm1, %v1494_v26 }
 0x3b8   :  { %v1842_v30 = vpop.eup %1841  ;;  %1771 = vmatpush3.bf16.msra.mxu0 %v1768_v28 }
 0x3b9   :  { %v1772_v31 = vpack.c.bf16 %v1840_v29, %v1842_v30  ;;  %v1227_v16 = vpop.permute.xlu1 %1226 }
 0x3bb   :  { %1773 = vmatprep.subr.bf16.mxu0 %v1772_v31 }
 0x3bc   :  { %1775 = vmatpush3.bf16.msra.mxu0 %v1772_v31 }
 0x3bd   :  { %v989_v17 = vpop.permute.xlu1 %988 }
 0x3be   :  { %v994_v18 = vrot.slane %v989_v17, %v2180_v44 }
 0x3bf   :  { %1691 = vmatmul.mubr.msk.f32.vlgmr.msra.gmra.mrb[12].mxu0 %vm186_vm1, %v1495_v32 }
 0x3c0   :  { %1693 = vmatprep.mubr.msk.f32.mxu0 %vm186_vm1, %v1496_v33 }
 0x3c3   :  { %1694 = vmatmul.mubr.msk.f32.gmra.mrb[14].mxu0 %vm186_vm1, %v1497_v34 }
 0x3c4   :  { %1723 = vmatprep.mubr.msk.f32.mxu0 %vm186_vm1, %v1521_v12 }
 0x489   :  { %v716_v47 = vpop.f32.mrb[10].mxu0 }
 0x48a   :  { %v717_v49 = vadd.f32 %v716_v47, %v646_v46  ;;  %v1673_v50 = vpop.f32.mrb[11].mxu0 }
 0x48c   :  { %v1417_v52 = vrot.slane %v717_v49, 7 }
 0x48e   :  { %v1426_v53 = vsel %vm1425_vm3, %v369_v51, %v1417_v52 }
 0x492   :  { %v1692_v55 = vpop.f32.mrb[12].mxu0 }
 0x493   :  { %v965_v56 = vadd.f32 %v1692_v55, %v869_v54  ;;  %v959_v57 = vpop.f32.mrb[13].mxu0 }
 0x494   :  { %v960_v58 = vadd.f32 %v959_v57, %v864_v35 }
 0x495   :  { %1843 = vtanh.f32 %v965_v56 }
 0x496   :  { %1845 = vtanh.f32 %v960_v58  ;;  %v1695_v60 = vpop.f32.mrb[14].mxu0  ;;  %v1337_v58 = vpop.permute.xlu1 %1336 }
 0x497   :  { %v975_v61 = vadd.f32 %v1695_v60, %v879_v59  ;;  %v969_v62 = vpop.f32.mrb[15].mxu0 }
 0x498   :  { %v970_v63 = vadd.f32 %v969_v62, %v874_v36 }
 0x499   :  { %1847 = vtanh.f32 %v975_v61 }
 0x49a   :  { %1849 = vtanh.f32 %v970_v63 }
 0x49f   :  { %v1844_v3 = vpop.eup %1843 }
 0x4a0   :  { %v1846_v4 = vpop.eup %1845 }
 0x4a1   :  { %v1777_v5 = vpack.c.bf16 %v1844_v3, %v1846_v4 }
 0x4a3   :  { %v1848_v27 = vpop.eup %1847  ;;  %1778 = vmatpush3.bf16.msra.mxu1 %v1777_v5 }
 0x4a4   :  { %v1850_v6 = vpop.eup %1849  ;;  %1779 = vmatprep.subr.bf16.mxu1 %v1892_v1 }
 0x4a5   :  { %v1780_v7 = vpack.c.bf16 %v1848_v27, %v1850_v6 }
 0x4a7   :  { %1781 = vmatpush3.bf16.msra.mxu1 %v1780_v7 }
 0x4a8   :  { %1707 = vmatprep.subr.mxu1 %v1939_v0 }
 0x4aa   :  { %1705 = vmatmul.mubr.msk.f32.vlgmr.msra.gmra.mrb[12].mxu1 %vm186_vm1, %v1506_v8 }
 0x4ab   :  { %1708 = vmatpush3.msra.mxu1 %v1939_v0  ;;  %1709 = vmatprep.mubr.msk.f32.mxu1 %vm56_vm0, %v1509_v9  ;;  %v1512_v0 = vld [vmem:[%s2251_s1 + $0x78] sm:$0xff] }
 0x4ac   :  { %1790 = vmatprep.subr.bf16.mxu1 %v1892_v1 }
 0x4ae   :  { %1710 = vmatmul.mubr.msk.f32.vlgmr.msra.gmra.mrb[14].mxu1 %vm56_vm0, %v1510_v10 }
 0x4af   :  { %1712 = vmatprep.mubr.msk.f32.mxu1 %vm56_vm0, %v1511_v11 }
 0x4b2   :  { %1713 = vmatmul.mubr.msk.f32.gmra.mrb[16].mxu1 %vm56_vm0, %v1512_v0 }
 0x4b3   :  { %1737 = vmatprep.mubr.msk.f32.mxu1 %vm1893_vm2, %v1894_v2 }
 0x57d   :  { %v1064_v19 = vpop.f32.mrb[12].mxu1 }
 0x57e   :  { %v1065_v20 = vadd.f32 %v1064_v19, %v994_v18  ;;  %v1706_v21 = vpop.f32.mrb[13].mxu1 }
 0x580   :  { %v1420_v22 = vrot.slane %v1065_v20, 6 }
 0x581   :  { %v1711_v23 = vpop.f32.mrb[14].mxu1 }
 0x582   :  { %v1182_v2 = vadd.f32 %v1711_v23, %v1086_v13  ;;  %v1176_v24 = vpop.f32.mrb[15].mxu1  ;;  %v1428_v25 = vsel %vm1427_vm4, %v1426_v53, %v1420_v22 }
 0x583   :  { %v1177_v26 = vadd.f32 %v1176_v24, %v2172_v37  ;;  %v1522_v37 = vld [vmem:[%s2253_s3 + $0x68] sm:$0xff] }
 0x584   :  { %1851 = vtanh.f32 %v1182_v2 }
 0x585   :  { %1853 = vtanh.f32 %v1177_v26  ;;  %v1714_v28 = vpop.f32.mrb[16].mxu1 }
 0x586   :  { %v1192_v29 = vadd.f32 %v1714_v28, %v1096_v14  ;;  %v1186_v30 = vpop.f32.mrb[17].mxu1 }
 0x587   :  { %v1187_v31 = vadd.f32 %v1186_v30, %v2174_v38  ;;  %v1523_v38 = vld [vmem:[%s2253_s3 + $0x70] sm:$0xff] }
 0x588   :  { %1855 = vtanh.f32 %v1192_v29 }
 0x589   :  { %1857 = vtanh.f32 %v1187_v31 }
 0x58e   :  { %v1852_v32 = vpop.eup %1851 }
 0x58f   :  { %v1854_v33 = vpop.eup %1853 }
 0x590   :  { %v1782_v34 = vpack.c.bf16 %v1852_v32, %v1854_v33 }
 0x592   :  { %v1856_v35 = vpop.eup %1855  ;;  %1783 = vmatprep.subr.bf16.mxu0 %v1782_v34 }
 0x593   :  { %v1858_v36 = vpop.eup %1857  ;;  %1785 = vmatpush3.bf16.msra.mxu0 %v1782_v34 }
 0x594   :  { %v1786_v41 = vpack.c.bf16 %v1856_v35, %v1858_v36 }
 0x596   :  { %1787 = vmatprep.subr.bf16.mxu0 %v1786_v41 }
 0x597   :  { %1789 = vmatpush3.bf16.msra.mxu0 %v1786_v41 }
 0x59a   :  { %1724 = vmatmul.mubr.msk.f32.vlgmr.msra.gmra.mrb[16].mxu0 %vm186_vm1, %v1522_v37 }
 0x59b   :  { %1726 = vmatprep.mubr.msk.f32.mxu0 %vm186_vm1, %v1523_v38 }
 0x59e   :  { %1727 = vmatmul.mubr.msk.f32.gmra.mrb[18].mxu0 %vm186_vm1, %v1524_v42 }
 0x66d   :  { %v1725_v43 = vpop.f32.mrb[16].mxu0 }
 0x66e   :  { %v1313_v45 = vadd.f32 %v1725_v43, %v1217_v15  ;;  %v1307_v46 = vpop.f32.mrb[17].mxu0 }
 0x66f   :  { %v1308_v47 = vadd.f32 %v1307_v46, %v2176_v39  ;;  %v1533_v39 = vld [vmem:[%s2255_s5 + $0x3] sm:$0x1] }
 0x670   :  { %1859 = vtanh.f32 %v1313_v45 }
 0x671   :  { %1861 = vtanh.f32 %v1308_v47  ;;  %v1728_v48 = vpop.f32.mrb[18].mxu0 }
 0x672   :  { %v1323_v49 = vadd.f32 %v1728_v48, %v1227_v16  ;;  %v1317_v50 = vpop.f32.mrb[19].mxu0 }
 0x673   :  { %v1318_v51 = vadd.f32 %v1317_v50, %v2178_v40  ;;  %v1342_v40 = vrot.slane %v1337_v58, %v2180_v44 }
 0x674   :  { %1863 = vtanh.f32 %v1323_v49 }
 0x675   :  { %1865 = vtanh.f32 %v1318_v51 }
 0x67a   :  { %v1860_v52 = vpop.eup %1859 }
 0x67b   :  { %v1862_v53 = vpop.eup %1861 }
 0x67c   :  { %v1791_v54 = vpack.c.bf16 %v1860_v52, %v1862_v53 }
 0x67e   :  { %v1864_v55 = vpop.eup %1863  ;;  %1792 = vmatpush3.bf16.msra.mxu1 %v1791_v54 }
 0x67f   :  { %v1866_v56 = vpop.eup %1865  ;;  %1793 = vmatprep.subr.bf16.mxu1 %v1892_v1 }
 0x680   :  { %v1794_v57 = vpack.c.bf16 %v1864_v55, %v1866_v56 }
 0x682   :  { %1795 = vmatpush3.bf16.msra.mxu1 %v1794_v57 }
 0x685   :  { %1738 = vmatmul.mubr.msk.f32.vlgmr.msra.gmra.mrb[18].mxu1 %vm186_vm1, %v1533_v39 }
 0x758   :  { %v1412_v59 = vpop.f32.mrb[18].mxu1 }
 0x759   :  { %v1413_v60 = vadd.f32 %v1412_v59, %v1342_v40  ;;  %v1739_v61 = vpop.f32.mrb[19].mxu1 }
 0x75b   :  { %v1423_v62 = vrot.slane %v1413_v60, 5 }
 0x75d   :  { %v1430_v1 = vsel %vm1429_vm5, %v1428_v25, %v1423_v62 }
 0x75e   :  { %1431 = vst [vmem:[#allocation2] sm:$0xf] %v1430_v1 }
 0x75f   :  { %1878 = shalt.err (!%p1875_p4)
}
 0x760   :  { %s1879_s19 = scalar_lea.hbm %s2257_s7, 64 }
 0x761   :  { %p1880_p5 = scmp.ne.s32.totalorder %s2257_s7, %s1879_s19  ;;  %p1883_p6 = scmp.lt.u32.totalorder %s1879_s19, %s2257_s7 }
 0x763   :  { %p1885_p7 = pnand %p1883_p6, %p1880_p5 }
 0x765   :  { %1888 = shalt.err (!%p1885_p7)
}
 0x766   :  { %1441 = dma.vmem_to_hbm [thread:$0]  %s1439_s16, 64, %s2257_s7, [#allocation3]  }
 0x767   :  { %1889 = dma.done.wait [#allocation3], 64  }
 0x768   :  { %1890 = vsyncadd [#allocation3], 4294967232 }
 0x769   :  { %1445 = vsyncpa [#allocation3], 1 }

</bundles_post_ra>
